<compile_context>
chip_gen: v5e
topology: v5e:2x2
jax: 0.10.0
libtpu: 0.0.40
codegen_flags: <defaults>
</compile_context>

<pallas_src>
import functools

import jax
import jax.numpy as jnp
from jax import lax
from jax.experimental import pallas as pl
from jax.experimental.pallas import tpu as pltpu

_EPS = 1e-12   # F.normalize default eps


def _round_up(x, m):
    return (x + m - 1) // m * m


@functools.lru_cache(maxsize=1)
def _vmem_capacity_bytes():
    """Per-generation VMEM capacity (128 MiB v5e/v6e, 64 MiB v7x)."""
    try:
        return int(pltpu.get_tpu_info().vmem_capacity_bytes)
    except Exception:
        return 64 * 1024 * 1024   # conservative (v7x-sized) fallback


def _choose_tiles(B, T, D, feat_bytes, vmem_cap):
    """Pick (tile_b, tile_t): biggest feature block whose double-buffered
    stream fits in ~40% of this generation's VMEM (leaving headroom for the
    resident accumulator / head weights / output buffers)."""
    budget = int(vmem_cap * 0.40)

    def blk(tb, tt):                       # double-buffered feature block
        return tb * tt * D * feat_bytes * 2

    tile_b = B if B <= 8 else 8
    tile_t = T if T <= 512 else 512
    # Shrink the time tile if even one block overflows the budget (huge D).
    while blk(tile_b, tile_t) > budget and tile_t > 8:
        tile_t = max(8, (tile_t // 2) // 8 * 8)
    # Large batch: grow the batch tile (amortizes the ~0.35us/grid-step cost).
    while tile_b < 32 and tile_b * 2 <= B and blk(tile_b * 2, tile_t) <= budget:
        tile_b *= 2
    # Small batch / long sequence: grow the time tile instead, keeping at
    # least two time tiles so the cross-core time split (v7x) stays available.
    while (tile_t < T and pl.cdiv(T, tile_t * 2) >= 2
           and blk(tile_b, tile_t * 2) <= budget):
        tile_t *= 2
    return tile_b, tile_t


# ----------------------------- Pallas kernels ------------------------------

def _masked_time_sum(x_ref, t_start, t_total, need_mask):
    """f32 sum of the (TB, TT, D) feature block over *valid* time rows."""
    x = x_ref[...].astype(jnp.float32)
    if need_mask:
        tidx = lax.broadcasted_iota(jnp.int32, x.shape, 1) + t_start
        x = jnp.where(tidx < t_total, x, 0.0)   # mask BEFORE the accumulate
    return jnp.sum(x, axis=1)


def _pool_norm_kernel(x_ref, o_ref, *, inv_t, t_total, tile_t, need_mask):
    # x_ref: (TB, TT, D) ; o_ref: (TB, D) f32 (doubles as the accumulator).
    t = pl.program_id(1)

    @pl.when(t == 0)
    def _():
        o_ref[...] = jnp.zeros_like(o_ref)

    o_ref[...] += _masked_time_sum(x_ref, t * tile_t, t_total, need_mask)

    @pl.when(t == pl.num_programs(1) - 1)
    def _():
        pooled = o_ref[...] * inv_t                        # mean over real T
        ssq = jnp.sum(pooled * pooled, axis=1, keepdims=True)
        o_ref[...] = pooled * lax.rsqrt(jnp.maximum(ssq, _EPS * _EPS))


def _pool_head_norm_kernel(x_ref, w_ref, b_ref, o_ref, acc_ref, *,
                           inv_t, t_total, tile_t, need_mask):
    # x_ref: (TB, TT, D) ; w_ref: (D, E) bf16 ; b_ref: (1, E) f32
    # o_ref: (TB, E) f32 ; acc_ref: (TB, D) f32
    t = pl.program_id(1)

    @pl.when(t == 0)
    def _():
        acc_ref[...] = jnp.zeros_like(acc_ref)

    acc_ref[...] += _masked_time_sum(x_ref, t * tile_t, t_total, need_mask)

    # ReLU -> Linear -> L2 normalize, once, on the final time step.
    @pl.when(t == pl.num_programs(1) - 1)
    def _():
        pooled = acc_ref[...] * inv_t
        h = jnp.maximum(pooled, 0.0).astype(jnp.bfloat16)          # MXU-native
        e = jnp.dot(h, w_ref[...], preferred_element_type=jnp.float32)
        e = e + b_ref[...]
        ssq = jnp.sum(e * e, axis=1, keepdims=True)
        o_ref[...] = e * lax.rsqrt(jnp.maximum(ssq, _EPS * _EPS))


def _partial_sum_kernel(x_ref, o_ref, *, t_total, tile_t, tiles_per_split,
                        t_tiles, need_mask, has_overhang):
    # Cross-core time split: o_ref (1, TB, D) holds this split's partial sum.
    s = pl.program_id(0)
    t = pl.program_id(2)

    @pl.when(t == 0)
    def _():
        o_ref[...] = jnp.zeros_like(o_ref)

    g = s * tiles_per_split + t            # global time-tile index

    def _accumulate():
        o_ref[...] += _masked_time_sum(x_ref, g * tile_t, t_total,
                                       need_mask)[None]

    if has_overhang:
        pl.when(g < t_tiles)(_accumulate)  # skip the duplicated overhang tile
    else:
        _accumulate()


# ------------------------------ wrappers ------------------------------------

@functools.partial(jax.jit, static_argnames=("phead",))
def triplet_forward(ssl_features, w_emb, b_emb, phead=False):
    """ssl_features: (B, T, D) (bf16 or f32); w_emb: (D, E); b_emb: (E,) or (1, E)."""
    B, T, D = ssl_features.shape
    E = w_emb.shape[1]

    vmem_cap = _vmem_capacity_bytes()
    feat_bytes = ssl_features.dtype.itemsize
    tile_b, tile_t = _choose_tiles(B, T, D, feat_bytes, vmem_cap)
    b_tiles = pl.cdiv(B, tile_b)
    t_tiles = pl.cdiv(T, tile_t)
    need_mask = (T % tile_t) != 0          # last time tile is partial
    inv_t = 1.0 / T                        # mean over the REAL T

    vmem_limit = min(int(vmem_cap * 0.75), vmem_cap - (8 << 20))

    w_q = w_emb.astype(jnp.bfloat16)                       # bf16 head weights
    b_q = b_emb.astype(jnp.float32).reshape(1, E)

    # Split the time reduction across cores only when the batch axis offers
    # no parallel work (v7x megacore; a cheap serial loop on v5e/v6e).
    n_split = 2 if (b_tiles == 1 and t_tiles >= 2) else 1

    if n_split == 1:
        x_spec = pl.BlockSpec((tile_b, tile_t, D), lambda b, t: (b, t, 0))
        cp = pltpu.CompilerParams(
            dimension_semantics=("parallel", "arbitrary"),
            vmem_limit_bytes=vmem_limit,
        )

        if not phead:
            return pl.pallas_call(
                functools.partial(_pool_norm_kernel, inv_t=inv_t, t_total=T,
                                  tile_t=tile_t, need_mask=need_mask),
                out_shape=jax.ShapeDtypeStruct((B, D), jnp.float32),
                grid=(b_tiles, t_tiles),
                in_specs=[x_spec],
                out_specs=pl.BlockSpec((tile_b, D), lambda b, t: (b, 0)),
                compiler_params=cp,
            )(ssl_features)

        return pl.pallas_call(
            functools.partial(_pool_head_norm_kernel, inv_t=inv_t, t_total=T,
                              tile_t=tile_t, need_mask=need_mask),
            out_shape=jax.ShapeDtypeStruct((B, E), jnp.float32),
            grid=(b_tiles, t_tiles),
            in_specs=[
                x_spec,
                pl.BlockSpec((D, E), lambda b, t: (0, 0)),
                pl.BlockSpec((1, E), lambda b, t: (0, 0)),
            ],
            out_specs=pl.BlockSpec((tile_b, E), lambda b, t: (b, 0)),
            scratch_shapes=[pltpu.VMEM((tile_b, D), jnp.float32)],
            compiler_params=cp,
        )(ssl_features, w_q, b_q)

    # ---- cross-core time split: partial sums + tiny (B, D) jnp epilogue ----
    tps = pl.cdiv(t_tiles, n_split)
    has_overhang = (tps * n_split != t_tiles)

    def x_index_map(s, b, t):
        g = s * tps + t
        if has_overhang:                    # keep the DMA in bounds
            g = jnp.minimum(g, t_tiles - 1)
        return (b, g, 0)

    partial_sums = pl.pallas_call(
        functools.partial(_partial_sum_kernel, t_total=T, tile_t=tile_t,
                          tiles_per_split=tps, t_tiles=t_tiles,
                          need_mask=need_mask, has_overhang=has_overhang),
        out_shape=jax.ShapeDtypeStruct((n_split, B, D), jnp.float32),
        grid=(n_split, b_tiles, tps),
        in_specs=[pl.BlockSpec((tile_b, tile_t, D), x_index_map)],
        out_specs=pl.BlockSpec((1, tile_b, D), lambda s, b, t: (s, b, 0)),
        compiler_params=pltpu.CompilerParams(
            dimension_semantics=("parallel", "parallel", "arbitrary"),
            vmem_limit_bytes=vmem_limit,
        ),
    )(ssl_features)

    # Epilogue on a (B, D)/(B, E) tensor — negligible vs. the streamed reduce.
    pooled = jnp.sum(partial_sums, axis=0) * jnp.float32(inv_t)
    if phead:
        h = jnp.maximum(pooled, 0.0).astype(jnp.bfloat16)
        pooled = jnp.dot(h, w_q, preferred_element_type=jnp.float32) + b_q
    ssq = jnp.sum(pooled * pooled, axis=1, keepdims=True)
    return pooled * lax.rsqrt(jnp.maximum(ssq, _EPS * _EPS))


def ssl_standin(wav, w_proj):
    """Tiny deterministic stand-in for the injected ssl_model.

    wav: (B, 1, L) -> squeeze(1) -> frame into (B, T, F) -> project to (B, T, D).
    Plain JAX glue (not the hot path being benchmarked).
    """
    B, _, L = wav.shape
    F_, D = w_proj.shape
    T = L // F_
    frames = wav[:, 0, :].reshape(B, T, F_)
    return jnp.einsum("btf,fd->btd", frames, w_proj)


@functools.partial(jax.jit, static_argnames=("phead",))
def triplet_model(wav, params, phead=False):
    """Full forward matching TripletModel.forward semantics."""
    # bf16 features (fuses with the stand-in projection under jit; stands in
    # for the SSL backbone emitting bf16 activations).
    feats = ssl_standin(wav, params["w_ssl"]).astype(jnp.bfloat16)
    return triplet_forward(feats, params["w_emb"], params["b_emb"], phead=phead)


# ------------------------------- main ---------------------------------------

def _reference(feats_f32, w_emb, b_emb, phead):
    """Pure-JAX reference (same bf16 feature / head-weight quantization)."""
    pooled = jnp.mean(feats_f32, axis=1)
    if phead:
        h = jnp.maximum(pooled, 0.0).astype(jnp.bfloat16).astype(jnp.float32)
        wq = w_emb.astype(jnp.bfloat16).astype(jnp.float32)
        x = jnp.dot(h, wq, precision=lax.Precision.HIGHEST) + b_emb.reshape(1, -1)
    else:
        x = pooled
    n = jnp.maximum(jnp.linalg.norm(x, axis=1, keepdims=True), _EPS)
    return x / n


def _run_case(name, key, B, L, frame, d_ssl, emb):
    k_wav, k_ssl, k_w, k_b = jax.random.split(key, 4)
    wav = jax.random.normal(k_wav, (B, 1, L), dtype=jnp.float32)
    w_ssl = jax.random.uniform(k_ssl, (frame, d_ssl), dtype=jnp.float32,
                               minval=-1.0, maxval=1.0) / jnp.sqrt(float(frame))
    bound = 1.0 / (d_ssl ** 0.5)
    # Linear(ssl_features -> emb_dim): weight stored already transposed (D, E).
    w_emb = jax.random.uniform(k_w, (d_ssl, emb), dtype=jnp.float32,
                               minval=-bound, maxval=bound)
    b_emb = jax.random.uniform(k_b, (emb,), dtype=jnp.float32,
                               minval=-bound, maxval=bound)
    params = {"w_ssl": w_ssl, "w_emb": w_emb, "b_emb": b_emb}

    out_nohead = triplet_model(wav, params, phead=False)   # (B, d_ssl)
    out_phead = triplet_model(wav, params, phead=True)     # (B, emb)
    jax.block_until_ready((out_nohead, out_phead))

    feats = ssl_standin(wav, w_ssl).astype(jnp.bfloat16).astype(jnp.float32)
    ref_nohead = _reference(feats, w_emb, b_emb, False)
    ref_phead = _reference(feats, w_emb, b_emb, True)

    assert out_nohead.shape == (B, d_ssl) and out_phead.shape == (B, emb)
    assert jnp.allclose(out_nohead, ref_nohead, atol=2e-3, rtol=2e-3), \
        f"{name}: no-head mismatch"
    assert jnp.allclose(out_phead, ref_phead, atol=2e-3, rtol=2e-3), \
        f"{name}: phead mismatch"


if __name__ == "__main__":
    key = jax.random.PRNGKey(0)
    k1, k2 = jax.random.split(key)

    # Case 1: tiny shapes (T=8) -> fused single-pass kernels (finalize in-kernel).
    _run_case("small", k1, B=2, L=128, frame=16, d_ssl=32, emb=16)

    # Case 2: long sequence (T=1100, not a tile multiple) -> exercises the
    # in-kernel time mask and the cross-core split + jnp epilogue path.
    _run_case("long", k2, B=2, L=1100 * 16, frame=16, d_ssl=32, emb=16)

    print("KERNEL_OK")
</pallas_src>

<mosaic_0001>
module attributes {stable_mosaic.version = 11 : i64} {
  func.func @_pool_norm_kernel(%arg0: i32, %arg1: i32, %arg2: memref<2x8x32xbf16, #tpu.memory_space<vmem>>, %arg3: memref<2x32xf32, #tpu.memory_space<vmem>>) attributes {dimension_semantics = [#tpu.dimension_semantics<parallel>, #tpu.dimension_semantics<arbitrary>], iteration_bounds = array<i64: 1, 1>, scalar_prefetch = 0 : i64, scratch_operands = 0 : i64, tpu.core_type = #tpu.core_type<tc>, window_params = [{transform_indices = @transform_0, window_bounds = array<i64: 2, 8, 32>}, {transform_indices = @transform_1, window_bounds = array<i64: 2, 32>}]} {
    %c0_i32 = arith.constant 0 : i32
    %0 = arith.cmpi eq, %arg1, %c0_i32 : i32
    %1 = arith.extui %0 : i1 to i32
    %c0_i32_0 = arith.constant 0 : i32
    %2 = arith.cmpi ne, %1, %c0_i32_0 : i32
    scf.if %2 {
      %cst_9 = arith.constant 0.000000e+00 : f32
      %12 = vector.broadcast %cst_9 : f32 to vector<2x32xf32>
      %c0_10 = arith.constant 0 : index
      %c0_11 = arith.constant 0 : index
      %13 = vector.load %arg3[%c0_10, %c0_11] : memref<2x32xf32, #tpu.memory_space<vmem>>, vector<2x32xf32>
      tpu.vector_store %arg3[%c0_10, %c0_11], %12 {strides = array<i32>} : memref<2x32xf32, #tpu.memory_space<vmem>>, vector<2x32xf32>,
    } else {
    }
    %c0 = arith.constant 0 : index
    %c0_1 = arith.constant 0 : index
    %3 = vector.load %arg3[%c0, %c0_1] : memref<2x32xf32, #tpu.memory_space<vmem>>, vector<2x32xf32>
    %c0_2 = arith.constant 0 : index
    %c0_3 = arith.constant 0 : index
    %c0_4 = arith.constant 0 : index
    %4 = vector.load %arg2[%c0_2, %c0_3, %c0_4] : memref<2x8x32xbf16, #tpu.memory_space<vmem>>, vector<2x8x32xbf16>
    %5 = arith.extf %4 : vector<2x8x32xbf16> to vector<2x8x32xf32>
    %cst = arith.constant dense<0.000000e+00> : vector<2x32xf32>
    %6 = vector.multi_reduction <add>, %5, %cst [1] : vector<2x8x32xf32> to vector<2x32xf32>
    %7 = arith.addf %3, %6 : vector<2x32xf32>
    %c0_5 = arith.constant 0 : index
    %c0_6 = arith.constant 0 : index
    %8 = vector.load %arg3[%c0_5, %c0_6] : memref<2x32xf32, #tpu.memory_space<vmem>>, vector<2x32xf32>
    tpu.vector_store %arg3[%c0_5, %c0_6], %7 {strides = array<i32>} : memref<2x32xf32, #tpu.memory_space<vmem>>, vector<2x32xf32>,
    %c0_i32_7 = arith.constant 0 : i32
    %9 = arith.cmpi eq, %arg1, %c0_i32_7 : i32
    %10 = arith.extui %9 : i1 to i32
    %c0_i32_8 = arith.constant 0 : i32
    %11 = arith.cmpi ne, %10, %c0_i32_8 : i32
    scf.if %11 {
      %c0_9 = arith.constant 0 : index
      %c0_10 = arith.constant 0 : index
      %12 = vector.load %arg3[%c0_9, %c0_10] : memref<2x32xf32, #tpu.memory_space<vmem>>, vector<2x32xf32>
      %cst_11 = arith.constant 1.250000e-01 : f32
      %13 = vector.broadcast %cst_11 : f32 to vector<2x32xf32>
      %14 = arith.mulf %12, %13 : vector<2x32xf32>
      %15 = arith.mulf %14, %14 : vector<2x32xf32>
      %cst_12 = arith.constant dense<0.000000e+00> : vector<2xf32>
      %16 = vector.multi_reduction <add>, %15, %cst_12 [1] : vector<2x32xf32> to vector<2xf32>
      %17 = vector.shape_cast %16 : vector<2xf32> to vector<2x1xf32>
      %cst_13 = arith.constant 1.000000e-24 : f32
      %18 = vector.broadcast %cst_13 : f32 to vector<2x1xf32>
      %19 = arith.maximumf %17, %18 : vector<2x1xf32>
      %20 = math.rsqrt %19 : vector<2x1xf32>
      %21 = vector.broadcast %20 : vector<2x1xf32> to vector<2x32xf32>
      %22 = arith.mulf %14, %21 : vector<2x32xf32>
      %c0_14 = arith.constant 0 : index
      %c0_15 = arith.constant 0 : index
      %23 = vector.load %arg3[%c0_14, %c0_15] : memref<2x32xf32, #tpu.memory_space<vmem>>, vector<2x32xf32>
      tpu.vector_store %arg3[%c0_14, %c0_15], %22 {strides = array<i32>} : memref<2x32xf32, #tpu.memory_space<vmem>>, vector<2x32xf32>,
    } else {
    }
    return
  }
  func.func @transform_0(%arg0: i32, %arg1: i32) -> (i32, i32, i32) {
    %c0_i32 = arith.constant 0 : i32
    %c0_i32_0 = arith.constant 0 : i32
    return %arg0, %arg1, %c0_i32 : i32, i32, i32
  }
  func.func @transform_1(%arg0: i32, %arg1: i32) -> (i32, i32) {
    %c0_i32 = arith.constant 0 : i32
    %c0_i32_0 = arith.constant 0 : i32
    return %arg0, %c0_i32 : i32, i32
  }
}

</mosaic_0001>

<bundles_post_ra>
// kernel: triplet_forward.1
= control target key start
LH: loop header
LB: loop body
LE: loop exit
PB: predicated region body
PF: predicated region fallthrough
CT: control target
= control target key end

     0   :  { %6 = vsyncpa [#allocation3], 0  ;;  %s186_s0 = inlined_call_operand.hbm [shape: bf16[2,8,32], index: 0, kind: input, shape index: {}]   ;;  %s187_s1 = inlined_call_operand.hbm [shape: f32[2,32], index: 1, kind: output, shape index: {}]  }
   0x1   :  { %7 = vsyncpa [#allocation4], 0  ;;  %s12_s8 = sshll.u32 %s186_s0, 4  ;;  %s161_s9 = smov [#allocation2]   ;;  %s13_s8 = int_to_ptr.hbm [resolvable:$true] %s12_s8 }
   0x2   :  { %s14_s10 = sshll.u32 %s161_s9, 4  ;;  %s162_s11 = smov 64   ;;  %s15_s10 = int_to_ptr.vmem [resolvable:$true] %s14_s10 }
   0x3   :  { %s163_s12 = smov 4  }
   0x4   :  { %20 = dma.hbm_to_vmem [thread:$0]  %s13_s8, 128, %s15_s10, [#allocation3], %s162_s11, %s162_s11, %s163_s12  }
   0x5   :  { %157 = dma.done.wait [#allocation3], 128  }
   0x6   :  { %158 = vsyncadd [#allocation3], 4294967168  ;;  %vm29_vm0 = vcmask 254976   ;;  %v164_v0 = vmov 0.0   ;;  %v99_v1 = vld [vmem:[#allocation2] sm:$0xff]   ;;  %vm36_vm1 = vcmask 261120  }
   0x7   :  { %30 = vst.msk [vmem:[#allocation5] sm:$0x3] %vm29_vm0, %v164_v0  ;;  %v100_v2 = vunpack.c.l.bf16 %v99_v1  ;;  %v101_v3 = vunpack.c.h.bf16 %v99_v1  ;;  %vm53_vm2 = vcmask 1041409   ;;  %s165_s0 = smov [#allocation5]   ;;  %s88_s16 = sshll.u32 %s187_s1, 4  ;;  %s89_s16 = int_to_ptr.hbm [resolvable:$true] %s88_s16 }
   0x8   :  { %s86_s13 = sshll.u32 %s165_s0, 4  ;;  %s87_s13 = int_to_ptr.vmem [resolvable:$true] %s86_s13 }
   0x9   :  { %v37_v4 = vsel %vm36_vm1, %v100_v2, 0.0  ;;  %v44_v5 = vsel %vm36_vm1, %v101_v3, 0.0 }
   0xa   :  { %v38_v6 = vrot.slane %v37_v4, 4  ;;  %v45_v7 = vrot.slane %v44_v5, 4 }
   0xc   :  { %v39_v8 = vadd.f32 %v38_v6, %v37_v4  ;;  %v46_v9 = vadd.f32 %v45_v7, %v44_v5 }
   0xe   :  { %v40_v10 = vrot.slane %v39_v8, 2  ;;  %v47_v11 = vrot.slane %v46_v9, 2  ;;  %v31_v16 = vld [vmem:[#allocation5] sm:$0x3] }
  0x10   :  { %v41_v12 = vadd.f32 %v40_v10, %v39_v8  ;;  %v48_v13 = vadd.f32 %v47_v11, %v46_v9 }
  0x12   :  { %v42_v14 = vrot.slane %v41_v12, 1  ;;  %v49_v15 = vrot.slane %v48_v13, 1 }
  0x14   :  { %v43_v17 = vadd.f32 %v42_v14, %v41_v12  ;;  %v50_v18 = vadd.f32 %v49_v15, %v48_v13 }
  0x16   :  { %v54_v19 = vsel %vm53_vm2, %v50_v18, %v43_v17 }
  0x17   :  { %v56_v20 = vadd.f32 %v54_v19, %v31_v16 }
  0x19   :  { %58 = vst.msk [vmem:[#allocation5] sm:$0x3] %vm29_vm0, %v56_v20 }
  0x20   :  { %v62_v21 = vld [vmem:[#allocation5] sm:$0x3] }
  0x21   :  { %v63_v22 = vmul.f32 0.125, %v62_v21 }
  0x23   :  { %v64_v23 = vmul.f32 %v63_v22, %v63_v22 }
  0x25   :  { %v65_v24 = vsel %vm29_vm0, %v64_v23, 0.0 }
  0x26   :  { %66 = vadd.xlane.f32.xlu0 %v65_v24 }
  0x99   :  { %v67_v25 = vpop.xlane.xlu0 %66 }
  0x9a   :  { %v68_v26 = vmax.f32 %v67_v25, 1e-24 }
  0x9c   :  { %107 = vrsqrt.f32 %v68_v26  ;;  %vm75_vm4 = vweird.f32 %v68_v26 }
  0xa2   :  { %v108_v27 = vpop.eup %107 }
  0xa3   :  { %v70_v28 = vmul.f32 %v108_v27, %v68_v26  ;;  %vm76_vm3 = vweird.f32 %v108_v27 }
  0xa4   :  { %vm77_vm5 = vmor %vm75_vm4, %vm76_vm3 }
  0xa5   :  { %v71_v29 = vmul.f32 %v108_v27, %v70_v28 }
  0xa7   :  { %v72_v30 = vmul.f32 0.5, %v71_v29 }
  0xa9   :  { %v73_v31 = vsub.f32 1.5, %v72_v30 }
  0xab   :  { %v74_v32 = vmul.f32 %v108_v27, %v73_v31 }
  0xad   :  { %v78_v33 = vsel %vm77_vm5, %v108_v27, %v74_v32 }
  0xae   :  { %v79_v34 = vmul.f32 %v78_v33, %v63_v22 }
  0xb0   :  { %80 = vst.msk [vmem:[#allocation5] sm:$0x3] %vm29_vm0, %v79_v34 }
  0xb1   :  { %91 = dma.vmem_to_hbm [thread:$0]  %s87_s13, 32, %s89_s16, [#allocation4]  }
  0xb2   :  { %159 = dma.done.wait [#allocation4], 32  }
  0xb3   :  { %160 = vsyncadd [#allocation4], 4294967264 }
  0xb4   :  { %96 = vsyncpa [#allocation3], 1 }
  0xb5   :  { %97 = vsyncpa [#allocation4], 1 }

</bundles_post_ra>
